<compile_context>
chip_gen: v6e
topology: v6e:2x2x1
jax: 0.10.0
libtpu: 0.0.40
codegen_flags: <defaults>
</compile_context>

<pallas_src>
import functools

import jax
import jax.numpy as jnp
from jax.experimental import pallas as pl
from jax.experimental.pallas import tpu as pltpu


def _round_up(x, m):
    return -(-x // m) * m


def _plan(N, C, S, tile_s_override=None):
    """Pick row-block size, spatial tile (by bytes) and a generation-aware VMEM limit."""
    R = N * C

    # ---- rows per block: pack whole batch elements so nb*C is a multiple of 8 ----
    if R % 8 == 0:
        nb = N
        for d in range(1, N + 1):
            if N % d == 0 and (d * C) % 8 == 0:
                nb = d
                break
    else:
        # TODO(synk): pathological (R not a multiple of 8) falls back to one full-row
        # block; fine for small N*C, suboptimal for very large odd batch*channel counts.
        nb = N
    RB = nb * C                       # either a multiple of 8 or equal to the full R

    # ---- generation-aware VMEM / tile byte budgets ----
    vmem_cap = 64 * 1024 * 1024       # conservative default (v7x per-TC) if query fails
    try:
        info = pltpu.get_tpu_info()
        vmem_cap = int(getattr(info, "vmem_capacity_bytes", vmem_cap))
    except Exception:
        pass
    if vmem_cap >= 96 * 1024 * 1024:  # v5e / v6e: 128 MiB physical VMEM
        vmem_limit = 64 * 1024 * 1024
        tile_budget = 4 * 1024 * 1024
    else:                             # v7x: 64 MiB per TensorCore
        vmem_limit = 32 * 1024 * 1024
        tile_budget = 2 * 1024 * 1024

    # ---- spatial tile, sized by bytes (f32 in-kernel working set) ----
    if tile_s_override is not None:
        tile_s = int(tile_s_override)
    else:
        cap = max(128, (tile_budget // (4 * RB)) // 128 * 128)
        if S % 128 == 0:
            tile_s = min(cap, S)
            while S % tile_s != 0:    # largest 128-multiple divisor of S <= cap
                tile_s -= 128
        elif RB * S * 4 <= 2 * tile_budget:
            tile_s = S                # one full-S block: legal even if not 128-aligned
        else:
            tile_s = cap              # pad S up to a multiple of `cap` (zeros are exact)
    assert tile_s % 128 == 0 or tile_s == S, ("bad tile_s", tile_s, S)

    S_pad = _round_up(S, tile_s)
    return RB, tile_s, S_pad, vmem_limit


# ----------------------------------------------------------------------------
# Pass 1: lane-dense partial sums of U over S (per row-block, per s-tile).
# ----------------------------------------------------------------------------
def _gap_partial_kernel(u_ref, p_ref):
    # u_ref: (RB, TILE_S) input dtype;  p_ref: (RB, 128) f32 (block sum, lane-broadcast)
    u = u_ref[...].astype(jnp.float32)
    s = jnp.sum(u, axis=-1, keepdims=True)            # (RB, 1)
    p_ref[...] = jnp.broadcast_to(s, p_ref.shape)     # lane-dense (unmasked) store


# ----------------------------------------------------------------------------
# Pass 2: fused apply   out = U * (z + sigmoid(sum_c ws[c] * U[n, c, :]))
# ----------------------------------------------------------------------------
def _scse_apply_kernel(z_ref, wsr_ref, u_ref, o_ref, *, groups_per_block, channels):
    # z_ref  : (RB, 1) f32   per-(n, c) channel (cSE) gate
    # wsr_ref: (RB, 1) f32   sSE weight replicated per packed row: ws[row % C]
    # u_ref  : (RB, T)       input dtype
    # o_ref  : (RB, T)       output (same dtype as input)
    u = u_ref[...].astype(jnp.float32)
    p = u * wsr_ref[...]                                              # (RB, T)

    if groups_per_block == 1:
        # Single batch element in this block: plain sublane reduce over C rows.
        q = jax.nn.sigmoid(jnp.sum(p, axis=0, keepdims=True))         # (1, T)
    else:
        # Several batch elements packed on the sublane axis: exact-f32 grouped reduce
        # via masking (VPU selects + XLU sublane reduces; stays off the MXU).
        gid = jax.lax.broadcasted_iota(jnp.int32, (u.shape[0], 1), 0) // channels
        logit = jnp.zeros_like(u)
        for b in range(groups_per_block):                              # static, small
            in_g = gid == b
            qb = jnp.sum(jnp.where(in_g, p, 0.0), axis=0, keepdims=True)   # (1, T)
            logit = jnp.where(in_g, qb, logit)
        q = jax.nn.sigmoid(logit)                                      # (RB, T)

    # Fused gate apply: one add + one mul per element.
    o_ref[...] = (u * (z_ref[...] + q)).astype(o_ref.dtype)


def scse_forward(U, w_sse, w_sq, w_ex, *, tile_s=None, donate_input=False):
    """scSE forward.

    U: (N, C, D, H, W).  w_sse: (1, C) sSE conv.  w_sq: (C//2, C).  w_ex: (C, C//2).
    Returns an array of U's shape and dtype (math is done in f32 in-kernel).
    """
    N, C, D, H, W = U.shape
    S = D * H * W
    R = N * C

    RB, tile_s, S_pad, vmem_limit = _plan(N, C, S, tile_s)
    n_rows = R // RB
    n_s = S_pad // tile_s

    U2 = U.reshape(R, S)
    if S_pad != S:
        # TODO(synk): a masked last tile (pl.BoundedSlice) would avoid this extra HBM copy.
        U2 = jnp.pad(U2, ((0, 0), (0, S_pad - S)))

    cpar = pltpu.CompilerParams(
        dimension_semantics=("parallel", "parallel"),
        vmem_limit_bytes=vmem_limit,
    )

    # ---- Pass 1: per-(row-block, s-tile) partial sums, fully core-parallel ----
    partials = pl.pallas_call(
        _gap_partial_kernel,
        out_shape=jax.ShapeDtypeStruct((R, n_s * 128), jnp.float32),
        grid_spec=pltpu.PrefetchScalarGridSpec(
            num_scalar_prefetch=0,
            grid=(n_rows, n_s),
            in_specs=[pl.BlockSpec((RB, tile_s), lambda i, s: (i, s))],
            out_specs=pl.BlockSpec((RB, 128), lambda i, s: (i, s)),
        ),
        compiler_params=cpar,
    )(U2)

    # ---- Tiny squeeze/excite gate in plain JAX (exact f32 broadcast-sums, no MXU) ----
    f32 = jnp.float32
    row_sums = partials.reshape(R, n_s, 128)[:, :, 0].sum(axis=1)          # (R,)
    mean = (row_sums / float(S)).reshape(N, C)                             # true S; zero pad exact
    zc = jnp.sum(mean[:, :, None] * w_sq.astype(f32).T[None, :, :], axis=1)    # (N, C//2)
    zc = jnp.sum(zc[:, :, None] * w_ex.astype(f32).T[None, :, :], axis=1)      # (N, C)
    z = jax.nn.sigmoid(zc).reshape(R, 1)                                   # per-(n, c) gate

    # sSE weight replicated per packed row: ws_rows[r] = w_sse[0, r % C]
    ws_rows = jnp.tile(w_sse.reshape(C).astype(f32), R // C).reshape(R, 1)

    # ---- Pass 2: fused gate apply, fully parallel over (row-blocks, s-tiles) ----
    apply_kernel = functools.partial(
        _scse_apply_kernel, groups_per_block=RB // C, channels=C)
    out2 = pl.pallas_call(
        apply_kernel,
        out_shape=jax.ShapeDtypeStruct((R, S_pad), U.dtype),
        grid_spec=pltpu.PrefetchScalarGridSpec(
            num_scalar_prefetch=0,
            grid=(n_rows, n_s),
            in_specs=[
                pl.BlockSpec((RB, 1), lambda i, s: (i, 0)),        # z
                pl.BlockSpec((RB, 1), lambda i, s: (i, 0)),        # ws_rows
                pl.BlockSpec((RB, tile_s), lambda i, s: (i, s)),   # U
            ],
            out_specs=pl.BlockSpec((RB, tile_s), lambda i, s: (i, s)),
        ),
        compiler_params=cpar,
        input_output_aliases=({2: 0} if donate_input else {}),
    )(z, ws_rows, U2)

    if S_pad != S:
        out2 = out2[:, :S]
    return out2.reshape(N, C, D, H, W)


def scse_reference(U, w_sse, w_sq, w_ex):
    """Pure-JAX reference mirroring the PyTorch module (exact f32 broadcast-sums)."""
    N, C = U.shape[0], U.shape[1]
    # sSE
    q = jax.nn.sigmoid(jnp.sum(U * w_sse.reshape(1, C, 1, 1, 1), axis=1, keepdims=True))
    U_sse = U * q
    # cSE
    m = jnp.mean(U, axis=(2, 3, 4))                                        # (N, C)
    z = jnp.sum(m[:, :, None] * w_sq.T[None, :, :], axis=1)                # (N, C//2)
    z = jnp.sum(z[:, :, None] * w_ex.T[None, :, :], axis=1)                # (N, C)
    z = jax.nn.sigmoid(z)[:, :, None, None, None]
    return U * z + U_sse


if __name__ == "__main__":
    key = jax.random.PRNGKey(0)
    k_u, k_s, k_1, k_2 = jax.random.split(key, 4)

    N, C, D, H, W = 2, 4, 8, 8, 8                 # S = 512, N*C = 8 packed rows
    U = jax.random.normal(k_u, (N, C, D, H, W), dtype=jnp.float32)
    # Conv3d kernel_size=1, no bias -> plain matrices.
    w_sse = jax.random.normal(k_s, (1, C), dtype=jnp.float32) * 0.5        # sSE Conv1x1x1
    w_sq = jax.random.normal(k_1, (C // 2, C), dtype=jnp.float32) * 0.5    # Conv_Squeeze
    w_ex = jax.random.normal(k_2, (C, C // 2), dtype=jnp.float32) * 0.5    # Conv_Excitation

    ref = scse_reference(U, w_sse, w_sq, w_ex)

    # (a) auto (byte-budgeted) tiling — single spatial tile at this size.
    out = jax.block_until_ready(scse_forward(U, w_sse, w_sq, w_ex))
    assert out.shape == U.shape
    err = jnp.max(jnp.abs(out - ref))
    assert jnp.allclose(out, ref, atol=1e-5, rtol=1e-5), f"max abs err = {err}"

    # (b) forced 128-lane tiles — exercises the multi-s-tile grid and partial-sum path.
    out_t = jax.block_until_ready(scse_forward(U, w_sse, w_sq, w_ex, tile_s=128))
    err_t = jnp.max(jnp.abs(out_t - ref))
    assert jnp.allclose(out_t, ref, atol=1e-5, rtol=1e-5), f"max abs err = {err_t}"

    # (c) non-128-aligned spatial size (S = 210) — full-S blocks, no padding copy.
    D2, H2, W2 = 5, 6, 7
    U3 = jax.random.normal(k_u, (N, C, D2, H2, W2), dtype=jnp.float32)
    ref3 = scse_reference(U3, w_sse, w_sq, w_ex)
    out3 = jax.block_until_ready(scse_forward(U3, w_sse, w_sq, w_ex))
    err3 = jnp.max(jnp.abs(out3 - ref3))
    assert jnp.allclose(out3, ref3, atol=1e-5, rtol=1e-5), f"max abs err = {err3}"

    print("KERNEL_OK")
</pallas_src>

<mosaic_0001>
module attributes {stable_mosaic.version = 11 : i64} {
  func.func @_gap_partial_kernel(%arg0: i32, %arg1: i32, %arg2: memref<8x512xf32, #tpu.memory_space<vmem>>, %arg3: memref<8x128xf32, #tpu.memory_space<vmem>>) attributes {dimension_semantics = [#tpu.dimension_semantics<parallel>, #tpu.dimension_semantics<parallel>], iteration_bounds = array<i64: 1, 1>, scalar_prefetch = 0 : i64, scratch_operands = 0 : i64, tpu.core_type = #tpu.core_type<tc>, window_params = [{transform_indices = @transform_0, window_bounds = array<i64: 8, 512>}, {transform_indices = @transform_1, window_bounds = array<i64: 8, 128>}]} {
    %c0 = arith.constant 0 : index
    %c0_0 = arith.constant 0 : index
    %0 = vector.load %arg2[%c0, %c0_0] : memref<8x512xf32, #tpu.memory_space<vmem>>, vector<8x512xf32>
    %cst = arith.constant dense<0.000000e+00> : vector<8xf32>
    %1 = vector.multi_reduction <add>, %0, %cst [1] : vector<8x512xf32> to vector<8xf32>
    %2 = vector.shape_cast %1 : vector<8xf32> to vector<8x1xf32>
    %3 = vector.shape_cast %2 : vector<8x1xf32> to vector<8x1xf32>
    %4 = vector.broadcast %3 : vector<8x1xf32> to vector<8x128xf32>
    %c0_1 = arith.constant 0 : index
    %c0_2 = arith.constant 0 : index
    %5 = vector.load %arg3[%c0_1, %c0_2] : memref<8x128xf32, #tpu.memory_space<vmem>>, vector<8x128xf32>
    tpu.vector_store %arg3[%c0_1, %c0_2], %4 {strides = array<i32>} : memref<8x128xf32, #tpu.memory_space<vmem>>, vector<8x128xf32>,
    return
  }
  func.func @transform_0(%arg0: i32, %arg1: i32) -> (i32, i32) {
    %c0_i32 = arith.constant 0 : i32
    return %arg0, %arg1 : i32, i32
  }
  func.func @transform_1(%arg0: i32, %arg1: i32) -> (i32, i32) {
    %c0_i32 = arith.constant 0 : i32
    return %arg0, %arg1 : i32, i32
  }
}

</mosaic_0001>

<bundles_post_ra>
// kernel: tpu_custom_call.1
= control target key start
LH: loop header
LB: loop body
LE: loop exit
PB: predicated region body
PF: predicated region fallthrough
CT: control target
= control target key end

     0   :  { %6 = vsyncpa [#allocation3], 0  ;;  %s110_s0 = inlined_call_operand.hbm [shape: f32[8,512], index: 0, kind: input, shape index: {}]   ;;  %s111_s1 = inlined_call_operand.hbm [shape: f32[8,128], index: 1, kind: output, shape index: {}]  }
   0x1   :  { %7 = vsyncpa [#allocation4], 0  ;;  %s92_s6 = smov [#allocation2]  }
   0x2   :  { %s14_s7 = sshll.u32 %s92_s6, 4  ;;  %s15_s7 = int_to_ptr.vmem [resolvable:$true] %s14_s7 }
   0x3   :  { %s56_s8 = scalar_lea.vmem %s15_s7, 512  ;;  %p61_p1 = scmp.lt.s32.totalorder %s15_s7, %s15_s7 }
   0x4   :  { %p57_p0 = scmp.ne.s32.totalorder %s15_s7, %s56_s8  ;;  %p62_p2 = scmp.lt.s32.totalorder %s56_s8, %s56_s8 }
   0x6   :  { %p63_p3 = por %p62_p2, %p61_p1 }
   0x8   :  { %p64_p4 = pnand %p63_p3, %p57_p0 }
   0xa   :  { %67 = shalt.err (!%p64_p4)
}
   0xb   :  { %17 = dma.hbm_to_vmem [thread:$0]  %s110_s0, 512, %s15_s7, [#allocation3]  }
   0xc   :  { %88 = dma.done.wait [#allocation3], 512  }
   0xd   :  { %89 = vsyncadd [#allocation3], 4294966784  ;;  %v21_v0 = vld [vmem:[#allocation2] sm:$0xff]  ;;  %v22_v1 = vld [vmem:[#allocation2 + $0x8] sm:$0xff]  ;;  %s93_s11 = smov [#allocation5]  }
   0xe   :  { %v23_v2 = vld [vmem:[#allocation2 + $0x10] sm:$0xff]  ;;  %v25_v3 = vadd.f32 %v22_v1, %v21_v0  ;;  %v24_v4 = vld [vmem:[#allocation2 + $0x18] sm:$0xff]  ;;  %s37_s12 = sshll.u32 %s93_s11, 4  ;;  %s38_s12 = int_to_ptr.vmem [resolvable:$true] %s37_s12 }
   0xf   :  { %s68_s13 = scalar_lea.vmem %s38_s12, 128  ;;  %p73_p6 = scmp.lt.s32.totalorder %s38_s12, %s38_s12 }
  0x10   :  { %v26_v5 = vadd.f32 %v25_v3, %v23_v2  ;;  %p69_p5 = scmp.ne.s32.totalorder %s38_s12, %s68_s13  ;;  %p74_p7 = scmp.lt.s32.totalorder %s68_s13, %s68_s13 }
  0x12   :  { %v27_v6 = vadd.f32 %v26_v5, %v24_v4  ;;  %p75_p8 = por %p74_p7, %p73_p6 }
  0x14   :  { %28 = vadd.xlane.f32.xlu0 %v27_v6  ;;  %p76_p9 = pnand %p75_p8, %p69_p5 }
  0x9d   :  { %v29_v7 = vpop.xlane.xlu0 %28 }
  0x9e   :  { %30 = vst [vmem:[#allocation5] sm:$0xff] %v29_v7 }
  0x9f   :  { %79 = shalt.err (!%p76_p9)
}
  0xa0   :  { %40 = dma.vmem_to_hbm [thread:$0]  %s38_s12, 128, %s111_s1, [#allocation4]  }
  0xa1   :  { %90 = dma.done.wait [#allocation4], 128  }
  0xa2   :  { %91 = vsyncadd [#allocation4], 4294967168 }
  0xa3   :  { %44 = vsyncpa [#allocation3], 1 }
  0xa4   :  { %45 = vsyncpa [#allocation4], 1 }

</bundles_post_ra>
